<compile_context>
chip_gen: v7x
topology: tpu7x:2x2x1
jax: 0.10.0
libtpu: 0.0.40
codegen_flags: <defaults>
</compile_context>

<pallas_src>
import functools

import jax
import jax.numpy as jnp
from jax import lax
from jax.experimental import pallas as pl
from jax.experimental.pallas import tpu as pltpu


# Preferred tile sizes (capped to the padded problem dims below).
_TM = 256   # rows of A / output   (multiple of 8)
_TN = 256   # output channels      (multiple of 128; MXU-width friendly)
_TK = 256   # reduction dim        (multiple of 128)


# ----------------------------------------------------------------------------
# Pallas kernels: tiled matmul + fused bias/residual/ReLU epilogue
# ----------------------------------------------------------------------------
def _mm_bias_kernel(a_ref, w_ref, b_ref, o_ref, acc_ref, *, relu):
    """o = [relu](A @ W + bias), accumulated over the K grid axis."""
    k = pl.program_id(2)

    @pl.when(k == 0)
    def _():
        acc_ref[...] = jnp.zeros_like(acc_ref)

    acc_ref[...] += jnp.dot(a_ref[...], w_ref[...],
                            preferred_element_type=jnp.float32)

    @pl.when(k == pl.num_programs(2) - 1)
    def _():
        y = acc_ref[...] + b_ref[...]
        if relu:
            y = jnp.maximum(y, 0.0)
        o_ref[...] = y.astype(o_ref.dtype)


def _mm_bias_res_relu_kernel(a_ref, w_ref, b_ref, r_ref, o_ref, acc_ref):
    """o = relu(A @ W + bias + residual), accumulated over the K grid axis."""
    k = pl.program_id(2)

    @pl.when(k == 0)
    def _():
        acc_ref[...] = jnp.zeros_like(acc_ref)

    acc_ref[...] += jnp.dot(a_ref[...], w_ref[...],
                            preferred_element_type=jnp.float32)

    @pl.when(k == pl.num_programs(2) - 1)
    def _():
        y = acc_ref[...] + b_ref[...] + r_ref[...]
        o_ref[...] = jnp.maximum(y, 0.0).astype(o_ref.dtype)


def _round_up(x, m):
    return (x + m - 1) // m * m


def _tile_and_pad(dim, pref, mult):
    """Pick a tile (multiple of `mult`, <= pref unless dim is smaller) and the
    padded dim that is a multiple of that tile."""
    dim_r = _round_up(dim, mult)
    tile = min(pref, dim_r)
    return tile, _round_up(dim_r, tile)


def conv_bn_matmul(a, w_scaled, bias, *, relu=True, residual=None):
    """Tiled (M,K)@(K,C) with fused bias(+residual)+ReLU epilogue.

    a:        (M, K)  activation patches (any float dtype; cast to bf16)
    w_scaled: (K, C)  weights with the folded BN scale already applied
    bias:     (C,)    folded BN bias (f32)
    residual: (M, C)  optional residual added before the final ReLU (f32)
    """
    M, K = a.shape
    Kw, C = w_scaled.shape
    assert K == Kw

    tm, Mp = _tile_and_pad(M, _TM, 8)
    tn, Cp = _tile_and_pad(C, _TN, 128)
    tk, Kp = _tile_and_pad(K, _TK, 128)

    a_p = jnp.pad(a, ((0, Mp - M), (0, Kp - K))).astype(jnp.bfloat16)
    w_p = jnp.pad(w_scaled, ((0, Kp - K), (0, Cp - C))).astype(jnp.bfloat16)
    b_p = jnp.pad(bias.astype(jnp.float32).reshape(1, -1),
                  ((0, 0), (0, Cp - C)))

    in_specs = [
        pl.BlockSpec((tm, tk), lambda i, j, k: (i, k)),   # A
        pl.BlockSpec((tk, tn), lambda i, j, k: (k, j)),   # W (scale folded in)
        pl.BlockSpec((1, tn), lambda i, j, k: (0, j)),    # bias (epilogue only)
    ]
    args = [a_p, w_p, b_p]

    if residual is not None:
        r_p = jnp.pad(residual.astype(jnp.float32),
                      ((0, Mp - M), (0, Cp - C)))
        in_specs.append(pl.BlockSpec((tm, tn), lambda i, j, k: (i, j)))
        args.append(r_p)
        kernel = _mm_bias_res_relu_kernel
    else:
        kernel = functools.partial(_mm_bias_kernel, relu=relu)

    out = pl.pallas_call(
        kernel,
        out_shape=jax.ShapeDtypeStruct((Mp, Cp), jnp.float32),
        grid_spec=pltpu.PrefetchScalarGridSpec(
            num_scalar_prefetch=0,
            grid=(Mp // tm, Cp // tn, Kp // tk),
            in_specs=in_specs,
            out_specs=pl.BlockSpec((tm, tn), lambda i, j, k: (i, j)),
            scratch_shapes=[pltpu.VMEM((tm, tn), jnp.float32)],
        ),
        compiler_params=pltpu.CompilerParams(
            dimension_semantics=("parallel", "parallel", "arbitrary"),
            vmem_limit_bytes=32 * 1024 * 1024,
        ),
    )(*args)
    return out[:M, :C]


# ----------------------------------------------------------------------------
# Plain-JAX glue: im2col / weight reshaping / BN folding
# ----------------------------------------------------------------------------
def im2col_3x3(x_nhwc, stride):
    """x: (N,H,W,C) -> patches (N*Ho*Wo, 9*C) with padding=1."""
    N, H, W, C = x_nhwc.shape
    Ho = (H + 2 - 3) // stride + 1
    Wo = (W + 2 - 3) // stride + 1
    xp = jnp.pad(x_nhwc, ((0, 0), (1, 1), (1, 1), (0, 0)))
    cols = []
    for ky in range(3):
        for kx in range(3):
            sl = xp[:, ky:ky + stride * (Ho - 1) + 1:stride,
                       kx:kx + stride * (Wo - 1) + 1:stride, :]
            cols.append(sl)                       # each (N,Ho,Wo,C)
    patches = jnp.stack(cols, axis=3)             # (N,Ho,Wo,9,C)
    return patches.reshape(N * Ho * Wo, 9 * C), (N, Ho, Wo)


def fold_bn(gamma, beta, running_mean, running_var, eps=1e-5):
    scale = gamma / jnp.sqrt(running_var + eps)
    bias = beta - running_mean * scale
    return scale, bias                            # each (C,)


def conv_w_to_matmul(w_oihw):
    """PyTorch (Cout,Cin,KH,KW) -> (KH*KW*Cin, Cout), matching im2col order."""
    Cout, Cin, KH, KW = w_oihw.shape
    return jnp.transpose(w_oihw, (2, 3, 1, 0)).reshape(KH * KW * Cin, Cout)


# ----------------------------------------------------------------------------
# BasicBlock forward (option 'B'); BatchNorm in inference mode (running stats)
# ----------------------------------------------------------------------------
def basic_block_forward(x_nchw, params, stride):
    x = jnp.transpose(x_nchw, (0, 2, 3, 1))          # NCHW -> NHWC
    N, H, W, Cin = x.shape
    planes = params["conv1_w"].shape[0]

    # conv1 (3x3, stride) + bn1 + relu1 -- BN scale folded into the weights.
    s1, b1 = fold_bn(params["bn1_gamma"], params["bn1_beta"],
                     params["bn1_mean"], params["bn1_var"])
    w1 = conv_w_to_matmul(params["conv1_w"]) * s1[None, :]
    a1, (_, Ho, Wo) = im2col_3x3(x, stride)
    out1 = conv_bn_matmul(a1, w1, b1, relu=True)     # (N*Ho*Wo, planes) f32
    out1_nhwc = out1.reshape(N, Ho, Wo, planes)

    # conv2 (3x3, stride 1) + bn2, with the shortcut fused into the same kernel.
    s2, b2 = fold_bn(params["bn2_gamma"], params["bn2_beta"],
                     params["bn2_mean"], params["bn2_var"])
    w2 = conv_w_to_matmul(params["conv2_w"]) * s2[None, :]
    a2, _ = im2col_3x3(out1_nhwc, 1)

    if stride != 1 or Cin != planes:
        # option 'B': 1x1 conv (stride) + BN, fused as extra K columns.
        s_sc, b_sc = fold_bn(params["sc_gamma"], params["sc_beta"],
                             params["sc_mean"], params["sc_var"])
        w_sc = params["sc_w"].reshape(planes, Cin).T * s_sc[None, :]  # (Cin,planes)
        xs = x[:, ::stride, ::stride, :].reshape(N * Ho * Wo, Cin)
        a_f = jnp.concatenate([a2, xs], axis=1)
        w_f = jnp.concatenate([w2, w_sc], axis=0)
        out = conv_bn_matmul(a_f, w_f, b2 + b_sc, relu=True)
    else:
        # identity shortcut fused as a residual added on the last K step.
        res = x.reshape(N * Ho * Wo, planes)
        out = conv_bn_matmul(a2, w2, b2, residual=res)

    out_nhwc = out.reshape(N, Ho, Wo, planes)
    return jnp.transpose(out_nhwc, (0, 3, 1, 2))     # NHWC -> NCHW


# ----------------------------------------------------------------------------
# Pure-JAX reference (for correctness check)
# ----------------------------------------------------------------------------
def reference_forward(x_nchw, params, stride):
    def conv(x, w, strd, pad):
        return lax.conv_general_dilated(
            x, w, window_strides=(strd, strd), padding=[(pad, pad), (pad, pad)],
            dimension_numbers=("NCHW", "OIHW", "NCHW"))

    def bn(x, g, b, m, v, eps=1e-5):
        s = g / jnp.sqrt(v + eps)
        return x * s[None, :, None, None] + (b - m * s)[None, :, None, None]

    out = conv(x_nchw, params["conv1_w"], stride, 1)
    out = jnp.maximum(bn(out, params["bn1_gamma"], params["bn1_beta"],
                         params["bn1_mean"], params["bn1_var"]), 0.0)
    out = conv(out, params["conv2_w"], 1, 1)
    out = bn(out, params["bn2_gamma"], params["bn2_beta"],
             params["bn2_mean"], params["bn2_var"])
    in_planes = x_nchw.shape[1]
    planes = params["conv1_w"].shape[0]
    if stride != 1 or in_planes != planes:
        sc = conv(x_nchw, params["sc_w"], stride, 0)
        sc = bn(sc, params["sc_gamma"], params["sc_beta"],
                params["sc_mean"], params["sc_var"])
    else:
        sc = x_nchw
    return jnp.maximum(out + sc, 0.0)


# ----------------------------------------------------------------------------
def make_params(key, in_planes, planes):
    ks = jax.random.split(key, 8)
    return {
        "conv1_w": jax.random.normal(ks[0], (planes, in_planes, 3, 3), jnp.float32) * 0.1,
        "conv2_w": jax.random.normal(ks[1], (planes, planes, 3, 3), jnp.float32) * 0.1,
        "bn1_gamma": 1.0 + 0.1 * jax.random.normal(ks[2], (planes,), jnp.float32),
        "bn1_beta": 0.05 * jax.random.normal(ks[3], (planes,), jnp.float32),
        "bn1_mean": 0.02 * jax.random.normal(ks[4], (planes,), jnp.float32),
        "bn1_var": 1.0 + 0.1 * jnp.abs(jax.random.normal(ks[5], (planes,), jnp.float32)),
        "bn2_gamma": 1.0 + 0.1 * jax.random.normal(ks[6], (planes,), jnp.float32),
        "bn2_beta": jnp.zeros((planes,), jnp.float32),
        "bn2_mean": jnp.zeros((planes,), jnp.float32),
        "bn2_var": jnp.ones((planes,), jnp.float32),
        # option 'B' shortcut (1x1 conv + BN)
        "sc_w": jax.random.normal(ks[7], (planes, in_planes, 1, 1), jnp.float32) * 0.1,
        "sc_gamma": jnp.ones((planes,), jnp.float32),
        "sc_beta": jnp.zeros((planes,), jnp.float32),
        "sc_mean": jnp.zeros((planes,), jnp.float32),
        "sc_var": jnp.ones((planes,), jnp.float32),
    }


if __name__ == "__main__":
    key = jax.random.PRNGKey(0)
    k_x1, k_p1, k_x2, k_p2 = jax.random.split(key, 4)

    # Case 1: option-'B' downsampling shortcut (stride=2, channel expansion).
    in_planes, planes, stride = 4, 8, 2
    x = jax.random.normal(k_x1, (2, in_planes, 16, 16), jnp.float32)  # NCHW
    params = make_params(k_p1, in_planes, planes)
    out = jax.block_until_ready(basic_block_forward(x, params, stride))
    ref = jax.block_until_ready(reference_forward(x, params, stride))
    assert out.shape == ref.shape == (2, planes, 8, 8)
    # bf16 matmul operands -> slightly looser tolerance vs. the f32 reference.
    assert jnp.allclose(out, ref, atol=5e-2, rtol=5e-2), \
        float(jnp.max(jnp.abs(out - ref)))

    # Case 2: identity shortcut (stride=1, in_planes == planes).
    x2 = jax.random.normal(k_x2, (2, 8, 16, 16), jnp.float32)
    params2 = make_params(k_p2, 8, 8)
    out2 = jax.block_until_ready(basic_block_forward(x2, params2, 1))
    ref2 = jax.block_until_ready(reference_forward(x2, params2, 1))
    assert out2.shape == ref2.shape == (2, 8, 16, 16)
    assert jnp.allclose(out2, ref2, atol=5e-2, rtol=5e-2), \
        float(jnp.max(jnp.abs(out2 - ref2)))

    print("KERNEL_OK")
</pallas_src>

<mosaic_0001>
module attributes {stable_mosaic.version = 11 : i64} {
  func.func @_mm_bias_kernel(%arg0: i32, %arg1: i32, %arg2: i32, %arg3: memref<128x128xbf16, #tpu.memory_space<vmem>>, %arg4: memref<128x128xbf16, #tpu.memory_space<vmem>>, %arg5: memref<1x128xf32, #tpu.memory_space<vmem>>, %arg6: memref<128x128xf32, #tpu.memory_space<vmem>>, %arg7: memref<128x128xf32, #tpu.memory_space<vmem>>) attributes {dimension_semantics = [#tpu.dimension_semantics<parallel>, #tpu.dimension_semantics<parallel>, #tpu.dimension_semantics<arbitrary>], iteration_bounds = array<i64: 1, 1, 1>, scalar_prefetch = 0 : i64, scratch_operands = 1 : i64, tpu.core_type = #tpu.core_type<tc>, window_params = [{transform_indices = @transform_0, window_bounds = array<i64: 128, 128>}, {transform_indices = @transform_1, window_bounds = array<i64: 128, 128>}, {transform_indices = @transform_2, window_bounds = array<i64: 1, 128>}, {transform_indices = @transform_3, window_bounds = array<i64: 128, 128>}]} {
    %c0_i32 = arith.constant 0 : i32
    %0 = arith.cmpi eq, %arg2, %c0_i32 : i32
    %1 = arith.extui %0 : i1 to i32
    %c0_i32_0 = arith.constant 0 : i32
    %2 = arith.cmpi ne, %1, %c0_i32_0 : i32
    scf.if %2 {
      %cst_10 = arith.constant 0.000000e+00 : f32
      %12 = vector.broadcast %cst_10 : f32 to vector<128x128xf32>
      %c0_11 = arith.constant 0 : index
      %c0_12 = arith.constant 0 : index
      %13 = vector.load %arg7[%c0_11, %c0_12] : memref<128x128xf32, #tpu.memory_space<vmem>>, vector<128x128xf32>
      tpu.vector_store %arg7[%c0_11, %c0_12], %12 {strides = array<i32>} : memref<128x128xf32, #tpu.memory_space<vmem>>, vector<128x128xf32>,
    } else {
    }
    %c0 = arith.constant 0 : index
    %c0_1 = arith.constant 0 : index
    %3 = vector.load %arg7[%c0, %c0_1] : memref<128x128xf32, #tpu.memory_space<vmem>>, vector<128x128xf32>
    %c0_2 = arith.constant 0 : index
    %c0_3 = arith.constant 0 : index
    %4 = vector.load %arg3[%c0_2, %c0_3] : memref<128x128xbf16, #tpu.memory_space<vmem>>, vector<128x128xbf16>
    %c0_4 = arith.constant 0 : index
    %c0_5 = arith.constant 0 : index
    %5 = vector.load %arg4[%c0_4, %c0_5] : memref<128x128xbf16, #tpu.memory_space<vmem>>, vector<128x128xbf16>
    %cst = arith.constant dense<0.000000e+00> : vector<128x128xf32>
    %6 = tpu.matmul %4, %5, %cst {dimension_numbers = #tpu.dot_dimension_numbers<[1], [0], [0], [1], [0, 0, 1, 1], [], []>} : vector<128x128xbf16>, vector<128x128xbf16>, vector<128x128xf32> -> vector<128x128xf32>
    %7 = arith.addf %3, %6 : vector<128x128xf32>
    %c0_6 = arith.constant 0 : index
    %c0_7 = arith.constant 0 : index
    %8 = vector.load %arg7[%c0_6, %c0_7] : memref<128x128xf32, #tpu.memory_space<vmem>>, vector<128x128xf32>
    tpu.vector_store %arg7[%c0_6, %c0_7], %7 {strides = array<i32>} : memref<128x128xf32, #tpu.memory_space<vmem>>, vector<128x128xf32>,
    %c0_i32_8 = arith.constant 0 : i32
    %9 = arith.cmpi eq, %arg2, %c0_i32_8 : i32
    %10 = arith.extui %9 : i1 to i32
    %c0_i32_9 = arith.constant 0 : i32
    %11 = arith.cmpi ne, %10, %c0_i32_9 : i32
    scf.if %11 {
      %c0_10 = arith.constant 0 : index
      %c0_11 = arith.constant 0 : index
      %12 = vector.load %arg7[%c0_10, %c0_11] : memref<128x128xf32, #tpu.memory_space<vmem>>, vector<128x128xf32>
      %c0_12 = arith.constant 0 : index
      %c0_13 = arith.constant 0 : index
      %13 = vector.load %arg5[%c0_12, %c0_13] : memref<1x128xf32, #tpu.memory_space<vmem>>, vector<1x128xf32>
      %14 = vector.broadcast %13 : vector<1x128xf32> to vector<128x128xf32>
      %15 = arith.addf %12, %14 : vector<128x128xf32>
      %cst_14 = arith.constant 0.000000e+00 : f32
      %16 = vector.broadcast %cst_14 : f32 to vector<128x128xf32>
      %17 = arith.maximumf %15, %16 : vector<128x128xf32>
      %c0_15 = arith.constant 0 : index
      %c0_16 = arith.constant 0 : index
      %18 = vector.load %arg6[%c0_15, %c0_16] : memref<128x128xf32, #tpu.memory_space<vmem>>, vector<128x128xf32>
      tpu.vector_store %arg6[%c0_15, %c0_16], %17 {strides = array<i32>} : memref<128x128xf32, #tpu.memory_space<vmem>>, vector<128x128xf32>,
    } else {
    }
    return
  }
  func.func @transform_0(%arg0: i32, %arg1: i32, %arg2: i32) -> (i32, i32) {
    %c0_i32 = arith.constant 0 : i32
    return %arg0, %arg2 : i32, i32
  }
  func.func @transform_1(%arg0: i32, %arg1: i32, %arg2: i32) -> (i32, i32) {
    %c0_i32 = arith.constant 0 : i32
    return %arg2, %arg1 : i32, i32
  }
  func.func @transform_2(%arg0: i32, %arg1: i32, %arg2: i32) -> (i32, i32) {
    %c0_i32 = arith.constant 0 : i32
    %c0_i32_0 = arith.constant 0 : i32
    return %c0_i32, %arg1 : i32, i32
  }
  func.func @transform_3(%arg0: i32, %arg1: i32, %arg2: i32) -> (i32, i32) {
    %c0_i32 = arith.constant 0 : i32
    return %arg0, %arg1 : i32, i32
  }
}

</mosaic_0001>

<bundles_post_ra>
// kernel: tpu_custom_call.1
= control target key start
LH: loop header
LB: loop body
LE: loop exit
PB: predicated region body
PF: predicated region fallthrough
CT: control target
= control target key end

     0   :  { %8 = vsyncpa [#allocation4], 0  ;;  %s671_s0 = inlined_call_operand.hbm [shape: bf16[128,128], index: 0, kind: input, shape index: {}]   ;;  %s672_s1 = inlined_call_operand.hbm [shape: bf16[128,128], index: 1, kind: input, shape index: {}]   ;;  %s673_s2 = inlined_call_operand.vmem [shape: f32[1,128], index: 2, kind: input, shape index: {}]   ;;  %s674_s3 = inlined_call_operand.hbm [shape: f32[128,128], index: 3, kind: output, shape index: {}]  }
   0x1   :  { %9 = vsyncpa [#allocation7], 0 }
   0x2   :  { %10 = vsyncpa [#allocation5], 0  ;;  %s605_s12 = smov [#allocation3]   ;;  %s533_s16 = scalar_lea.hbm %s671_s0, 1024 }
   0x3   :  { %s16_s13 = sshll.u32 %s605_s12, 4  ;;  %p534_p0 = scmp.ne.s32.totalorder %s671_s0, %s533_s16  ;;  %s17_s13 = int_to_ptr.vmem [resolvable:$true] %s16_s13 }
   0x4   :  { %p537_p1 = scmp.lt.u32.totalorder %s533_s16, %s671_s0 }
   0x6   :  { %p539_p2 = pnand %p537_p1, %p534_p0 }
   0x8   :  { %542 = shalt.err (!%p539_p2)
}
   0x9   :  { %s543_s21 = scalar_lea.vmem %s17_s13, 1024  ;;  %p548_p4 = scmp.lt.s32.totalorder %s17_s13, %s17_s13 }
   0xa   :  { %p544_p3 = scmp.ne.s32.totalorder %s17_s13, %s543_s21  ;;  %p549_p5 = scmp.lt.s32.totalorder %s543_s21, %s543_s21 }
   0xc   :  { %p550_p6 = por %p549_p5, %p548_p4 }
   0xe   :  { %p551_p7 = pnand %p550_p6, %p544_p3 }
  0x10   :  { %554 = shalt.err (!%p551_p7)
}
  0x11   :  { %s606_s22 = smov 64   ;;  %s607_s23 = smov 4  }
  0x12   :  { %22 = dma.hbm_to_vmem [thread:$0]  %s671_s0, 1024, %s17_s13, [#allocation4], %s606_s22, %s606_s22, %s607_s23  }
  0x13   :  { %s608_s26 = smov [#allocation6]   ;;  %s555_s30 = scalar_lea.hbm %s672_s1, 1024 }
  0x14   :  { %s28_s27 = sshll.u32 %s608_s26, 4  ;;  %p556_p8 = scmp.ne.s32.totalorder %s672_s1, %s555_s30  ;;  %s29_s27 = int_to_ptr.vmem [resolvable:$true] %s28_s27 }
  0x15   :  { %p559_p9 = scmp.lt.u32.totalorder %s555_s30, %s672_s1 }
  0x17   :  { %p561_p10 = pnand %p559_p9, %p556_p8 }
  0x19   :  { %564 = shalt.err (!%p561_p10)
}
  0x1a   :  { %s565_s8 = scalar_lea.vmem %s29_s27, 1024  ;;  %p570_p12 = scmp.lt.s32.totalorder %s29_s27, %s29_s27 }
  0x1b   :  { %p566_p11 = scmp.ne.s32.totalorder %s29_s27, %s565_s8  ;;  %p571_p13 = scmp.lt.s32.totalorder %s565_s8, %s565_s8 }
  0x1d   :  { %p572_p0 = por %p571_p13, %p570_p12 }
  0x1f   :  { %p573_p1 = pnand %p572_p0, %p566_p11 }
  0x21   :  { %576 = shalt.err (!%p573_p1)
}
  0x22   :  { %34 = dma.hbm_to_vmem [thread:$0]  %s672_s1, 1024, %s29_s27, [#allocation7], %s606_s22, %s606_s22, %s607_s23  }
  0x23   :  { %599 = dma.done.wait [#allocation4], 1024  }
  0x24   :  { %600 = vsyncadd [#allocation4], 4294966272 }
  0x25   :  { %601 = dma.done.wait [#allocation7], 1024  }
  0x26   :  { %602 = vsyncadd [#allocation7], 4294966272  ;;  %v517_v0 = vld [vmem:[#allocation6] sm:$0xff]   ;;  %v518_v1 = vld [vmem:[#allocation6 + $0x8] sm:$0xff]  }
  0x27   :  { %462 = vmatprep.subr.bf16.mxu0 %v517_v0  ;;  %494 = vmatprep.subr.bf16.mxu1 %v517_v0  ;;  %v519_v2 = vld [vmem:[#allocation6 + $0x10] sm:$0xff]   ;;  %v520_v3 = vld [vmem:[#allocation6 + $0x18] sm:$0xff]   ;;  %v525_v4 = vld [vmem:[#allocation3] sm:$0xff]  }
  0x28   :  { %463 = vmatpush3.bf16.msra.mxu0 %v517_v0  ;;  %502 = vmatpush3.bf16.msra.mxu1 %v517_v0  ;;  %v526_v5 = vld [vmem:[#allocation3 + $0x20] sm:$0xff]   ;;  %v522_v7 = vld [vmem:[#allocation6 + $0x28] sm:$0xff]   ;;  %v523_v8 = vld [vmem:[#allocation6 + $0x30] sm:$0xff]  }
  0x29   :  { %464 = vmatprep.subr.bf16.mxu0 %v518_v1  ;;  %495 = vmatprep.subr.bf16.mxu1 %v518_v1  ;;  %v521_v6 = vld [vmem:[#allocation6 + $0x20] sm:$0xff]   ;;  %v524_v9 = vld [vmem:[#allocation6 + $0x38] sm:$0xff]   ;;  %v527_v10 = vld [vmem:[#allocation3 + $0x8] sm:$0xff]  }
  0x2a   :  { %478 = vmatprep.mubr.bf16.mxu0 %v525_v4  ;;  %486 = vmatprep.mubr.bf16.mxu1 %v526_v5  ;;  %v528_v11 = vld [vmem:[#allocation3 + $0x28] sm:$0xff]   ;;  %v529_v12 = vld [vmem:[#allocation3 + $0x10] sm:$0xff]   ;;  %v531_v14 = vld [vmem:[#allocation3 + $0x18] sm:$0xff]  }
  0x2b   :  { %v530_v13 = vld [vmem:[#allocation3 + $0x30] sm:$0xff]   ;;  %v532_v15 = vld [vmem:[#allocation3 + $0x38] sm:$0xff]   ;;  %v445_v16 = vld [vmem:[%s673_s2] ss:$0 sm:$0xff]  ;;  %s609_s2 = smov [#allocation8]  }
  0x2c   :  { %465 = vmatpush3.bf16.msra.mxu0 %v518_v1  ;;  %503 = vmatpush3.bf16.msra.mxu1 %v518_v1  ;;  %s416_s11 = sshll.u32 %s609_s2, 4  ;;  %s417_s11 = int_to_ptr.vmem [resolvable:$true] %s416_s11 }
  0x2d   :  { %466 = vmatprep.subr.bf16.mxu0 %v519_v2  ;;  %496 = vmatprep.subr.bf16.mxu1 %v519_v2  ;;  %s577_s12 = scalar_lea.vmem %s417_s11, 2048  ;;  %p582_p3 = scmp.lt.s32.totalorder %s417_s11, %s417_s11 }
  0x2e   :  { %p578_p2 = scmp.ne.s32.totalorder %s417_s11, %s577_s12  ;;  %p583_p4 = scmp.lt.s32.totalorder %s577_s12, %s577_s12 }
  0x30   :  { %467 = vmatpush3.bf16.msra.mxu0 %v519_v2  ;;  %504 = vmatpush3.bf16.msra.mxu1 %v519_v2  ;;  %p584_p5 = por %p583_p4, %p582_p3 }
  0x31   :  { %468 = vmatprep.subr.bf16.mxu0 %v520_v3  ;;  %497 = vmatprep.subr.bf16.mxu1 %v520_v3 }
  0x32   :  { %p585_p6 = pnand %p584_p5, %p578_p2 }
  0x34   :  { %469 = vmatpush3.bf16.msra.mxu0 %v520_v3  ;;  %505 = vmatpush3.bf16.msra.mxu1 %v520_v3 }
  0x35   :  { %470 = vmatprep.subr.bf16.mxu0 %v521_v6  ;;  %498 = vmatprep.subr.bf16.mxu1 %v521_v6 }
  0x38   :  { %471 = vmatpush3.bf16.msra.mxu0 %v521_v6  ;;  %506 = vmatpush3.bf16.msra.mxu1 %v521_v6 }
  0x39   :  { %472 = vmatprep.subr.bf16.mxu0 %v522_v7  ;;  %499 = vmatprep.subr.bf16.mxu1 %v522_v7 }
  0x3c   :  { %473 = vmatpush3.bf16.msra.mxu0 %v522_v7  ;;  %507 = vmatpush3.bf16.msra.mxu1 %v522_v7 }
  0x3d   :  { %474 = vmatprep.subr.bf16.mxu0 %v523_v8  ;;  %500 = vmatprep.subr.bf16.mxu1 %v523_v8 }
  0x40   :  { %475 = vmatpush3.bf16.msra.mxu0 %v523_v8  ;;  %508 = vmatpush3.bf16.msra.mxu1 %v523_v8 }
  0x41   :  { %476 = vmatprep.subr.bf16.mxu0 %v524_v9  ;;  %501 = vmatprep.subr.bf16.mxu1 %v524_v9 }
  0x44   :  { %477 = vmatpush3.bf16.msra.mxu0 %v524_v9  ;;  %509 = vmatpush3.bf16.msra.mxu1 %v524_v9 }
  0x47   :  { %479 = vmatmul.mubr.bf16.vlgmr.msra.gmra.mrb[0].mxu0 %v527_v10  ;;  %487 = vmatmul.mubr.bf16.vlgmr.msra.gmra.mrb[0].mxu1 %v528_v11 }
  0x48   :  { %482 = vmatprep.mubr.bf16.mxu0 %v529_v12  ;;  %490 = vmatprep.mubr.bf16.mxu1 %v530_v13 }
  0x4f   :  { %483 = vmatmul.mubr.bf16.gmra.mrb[4].mxu0 %v531_v14  ;;  %491 = vmatmul.mubr.bf16.gmra.mrb[4].mxu1 %v532_v15 }
 0x11a   :  { %v480_v17 = vpop.f32.mrb[0].mxu0  ;;  %v488_v18 = vpop.f32.mrb[0].mxu1 }
 0x11b   :  { %v365_v19 = vadd.f32 %v480_v17, %v445_v16  ;;  %v373_v20 = vadd.f32 %v488_v18, %v445_v16  ;;  %v242_v21 = vpop.f32.mrb[1].mxu0  ;;  %v274_v22 = vpop.f32.mrb[1].mxu1 }
 0x11c   :  { %v363_v23 = vadd.f32 %v445_v16, %v242_v21  ;;  %v371_v24 = vadd.f32 %v445_v16, %v274_v22  ;;  %v481_v25 = vpop.f32.mrb[2].mxu0  ;;  %v489_v26 = vpop.f32.mrb[2].mxu1 }
 0x11d   :  { %v381_v27 = vmax.f32 %v365_v19, 0.0  ;;  %v389_v28 = vmax.f32 %v373_v20, 0.0  ;;  %v366_v29 = vadd.f32 %v481_v25, %v445_v16  ;;  %v374_v30 = vadd.f32 %v489_v26, %v445_v16  ;;  %v245_v31 = vpop.f32.mrb[3].mxu0  ;;  %v277_v32 = vpop.f32.mrb[3].mxu1 }
 0x11e   :  { %v379_v33 = vmax.f32 %v363_v23, 0.0  ;;  %v387_v34 = vmax.f32 %v371_v24, 0.0  ;;  %v364_v35 = vadd.f32 %v445_v16, %v245_v31  ;;  %v372_v36 = vadd.f32 %v445_v16, %v277_v32 }
 0x11f   :  { %397 = vst [vmem:[#allocation8 + $0x10] sm:$0xff] %v381_v27  ;;  %405 = vst [vmem:[#allocation8 + $0x50] sm:$0xff] %v389_v28  ;;  %v382_v37 = vmax.f32 %v366_v29, 0.0  ;;  %v390_v38 = vmax.f32 %v374_v30, 0.0 }
 0x120   :  { %395 = vst [vmem:[#allocation8] sm:$0xff] %v379_v33  ;;  %403 = vst [vmem:[#allocation8 + $0x40] sm:$0xff] %v387_v34  ;;  %v380_v39 = vmax.f32 %v364_v35, 0.0  ;;  %v388_v40 = vmax.f32 %v372_v36, 0.0 }
 0x121   :  { %398 = vst [vmem:[#allocation8 + $0x18] sm:$0xff] %v382_v37  ;;  %406 = vst [vmem:[#allocation8 + $0x58] sm:$0xff] %v390_v38 }
 0x122   :  { %396 = vst [vmem:[#allocation8 + $0x8] sm:$0xff] %v380_v39  ;;  %404 = vst [vmem:[#allocation8 + $0x48] sm:$0xff] %v388_v40  ;;  %v484_v41 = vpop.f32.mrb[4].mxu0  ;;  %v492_v42 = vpop.f32.mrb[4].mxu1 }
 0x123   :  { %v369_v43 = vadd.f32 %v484_v41, %v445_v16  ;;  %v377_v44 = vadd.f32 %v492_v42, %v445_v16  ;;  %v258_v45 = vpop.f32.mrb[5].mxu0  ;;  %v290_v46 = vpop.f32.mrb[5].mxu1 }
 0x124   :  { %v367_v47 = vadd.f32 %v445_v16, %v258_v45  ;;  %v375_v48 = vadd.f32 %v445_v16, %v290_v46  ;;  %v485_v49 = vpop.f32.mrb[6].mxu0  ;;  %v493_v50 = vpop.f32.mrb[6].mxu1 }
 0x125   :  { %v385_v51 = vmax.f32 %v369_v43, 0.0  ;;  %v393_v52 = vmax.f32 %v377_v44, 0.0  ;;  %v370_v53 = vadd.f32 %v485_v49, %v445_v16  ;;  %v378_v54 = vadd.f32 %v493_v50, %v445_v16  ;;  %v261_v55 = vpop.f32.mrb[7].mxu0  ;;  %v293_v56 = vpop.f32.mrb[7].mxu1 }
 0x126   :  { %v383_v57 = vmax.f32 %v367_v47, 0.0  ;;  %v391_v58 = vmax.f32 %v375_v48, 0.0  ;;  %v368_v59 = vadd.f32 %v445_v16, %v261_v55  ;;  %v376_v60 = vadd.f32 %v445_v16, %v293_v56 }
 0x127   :  { %401 = vst [vmem:[#allocation8 + $0x30] sm:$0xff] %v385_v51  ;;  %409 = vst [vmem:[#allocation8 + $0x70] sm:$0xff] %v393_v52  ;;  %v386_v61 = vmax.f32 %v370_v53, 0.0  ;;  %v394_v62 = vmax.f32 %v378_v54, 0.0 }
 0x128   :  { %399 = vst [vmem:[#allocation8 + $0x20] sm:$0xff] %v383_v57  ;;  %407 = vst [vmem:[#allocation8 + $0x60] sm:$0xff] %v391_v58  ;;  %v384_v63 = vmax.f32 %v368_v59, 0.0  ;;  %v392_v0 = vmax.f32 %v376_v60, 0.0 }
 0x129   :  { %402 = vst [vmem:[#allocation8 + $0x38] sm:$0xff] %v386_v61  ;;  %410 = vst [vmem:[#allocation8 + $0x78] sm:$0xff] %v394_v62 }
 0x12a   :  { %400 = vst [vmem:[#allocation8 + $0x28] sm:$0xff] %v384_v63  ;;  %408 = vst [vmem:[#allocation8 + $0x68] sm:$0xff] %v392_v0 }
 0x12b   :  { %588 = shalt.err (!%p585_p6)
}
 0x12c   :  { %s589_s15 = scalar_lea.hbm %s674_s3, 2048 }
 0x12d   :  { %p590_p7 = scmp.ne.s32.totalorder %s674_s3, %s589_s15  ;;  %p593_p8 = scmp.lt.u32.totalorder %s589_s15, %s674_s3 }
 0x12f   :  { %p595_p9 = pnand %p593_p8, %p590_p7 }
 0x131   :  { %598 = shalt.err (!%p595_p9)
}
 0x132   :  { %s610_s20 = smov 128   ;;  %s611_s21 = smov 8  }
 0x133   :  { %422 = dma.vmem_to_hbm [thread:$0]  %s417_s11, 2048, %s674_s3, [#allocation5], %s610_s20, %s610_s20, %s611_s21  }
 0x134   :  { %603 = dma.done.wait [#allocation5], 2048  }
 0x135   :  { %604 = vsyncadd [#allocation5], 4294965248 }
 0x136   :  { %426 = vsyncpa [#allocation4], 1 }
 0x137   :  { %427 = vsyncpa [#allocation7], 1 }
 0x138   :  { %428 = vsyncpa [#allocation5], 1 }

</bundles_post_ra>
